<compile_context>
chip_gen: v7x
topology: tpu7x:2x2x1
jax: 0.10.0
libtpu: 0.0.40
codegen_flags: <defaults>
</compile_context>

<pallas_src>
import numpy as np
import jax
import jax.numpy as jnp
from jax.experimental import pallas as pl
from jax.experimental.pallas import tpu as pltpu

# ----------------------------- model config ---------------------------------
INPUT_SIZE = 32
N_CLASSES = 3
LATENT = 8
MED2, MED, MED3 = 20, 20, 10
PAD = 128          # lane padding for all feature dims
KROWS = 32         # padded contraction dim (max in_features == 32)
BN_EPS = 1e-5

# encoder: 10 blocks + final linear (11 linears, 10 BN)
ENC_DIMS = [(INPUT_SIZE, MED2), (MED2, MED)] + [(MED, MED)] * 6 + [(MED, MED3),
            (MED3, 2 * LATENT)]
# decoder: 9 blocks + final linear (10 linears, 9 BN)
DEC_DIMS = [(LATENT, MED3), (MED3, MED)] + [(MED, MED)] * 6 + [(MED, MED2),
            (MED2, INPUT_SIZE)]
N_ENC = len(ENC_DIMS)          # 11
N_DEC = len(DEC_DIMS)          # 10
N_ENC_BN = N_ENC - 1           # 10
N_DEC_BN = N_DEC - 1           # 9

# stacked layer ordering: [0..10] encoder, [11] classifier, [12..21] decoder
N_LAYERS = N_ENC + 1 + N_DEC   # 22
IDX_CLS = N_ENC                # 11
IDX_DEC = N_ENC + 1            # 12


# ------------------------------ Pallas kernel --------------------------------
def ci_vae_kernel(x_ref, w_ref, b_ref, out_ref):
    """x_ref: (TB, 128) f32; w_ref: (22, 32, 128) bf16; b_ref: (22, 128) f32;
    out_ref: (3, TB, 128) f32 with rows [mu|logvar, y_hat, x_hat]."""
    f32 = jnp.float32

    def linear(h, idx):
        # Only the first KROWS lanes of any activation are ever nonzero.
        a = h[:, :KROWS].astype(jnp.bfloat16)
        return (jnp.dot(a, w_ref[idx], preferred_element_type=f32)
                + b_ref[idx:idx + 1, :])

    h = x_ref[...]

    # ---- encoder: 10 x (Linear -> ReLU) [BN folded into next W/b] + final linear
    for i in range(N_ENC - 1):
        h = jnp.maximum(linear(h, i), 0.0)
    mulv = linear(h, N_ENC - 1)          # lanes [0, 2*LATENT) hold mu|logvar
    out_ref[0, :, :] = mulv

    # z = mu (eval-mode reparameterize). Padded weight rows >= LATENT are zero,
    # so the logvar lanes of `mulv` contribute nothing to the dots below.
    z = mulv

    # ---- classifier: Linear (Dropout == identity in eval) ----
    out_ref[1, :, :] = linear(z, IDX_CLS)

    # ---- decoder: 9 x (Linear -> ReLU) [BN folded] + final linear ----
    d = z
    for i in range(N_DEC - 1):
        d = jnp.maximum(linear(d, IDX_DEC + i), 0.0)
    out_ref[2, :, :] = linear(d, IDX_DEC + N_DEC - 1)


# ------------------------------ parameter setup ------------------------------
def _init_linear(key, fan_in, fan_out):
    k1, k2 = jax.random.split(key)
    bound = 1.0 / np.sqrt(fan_in)
    W = jax.random.uniform(k1, (fan_in, fan_out), jnp.float32, -bound, bound)
    b = jax.random.uniform(k2, (fan_out,), jnp.float32, -bound, bound)
    return W, b


def _init_bn(key, n):
    k1, k2, k3, k4 = jax.random.split(key, 4)
    gamma = 1.0 + 0.1 * jax.random.normal(k1, (n,), jnp.float32)
    beta = 0.1 * jax.random.normal(k2, (n,), jnp.float32)
    mean = 0.1 * jax.random.normal(k3, (n,), jnp.float32)
    var = 1.0 + 0.1 * jnp.abs(jax.random.normal(k4, (n,), jnp.float32))
    # eval-mode BN fused into a per-feature affine
    scale = gamma / jnp.sqrt(var + BN_EPS)
    shift = beta - mean * scale
    return scale, shift


def _make_stack(key, dims, n_bn):
    """Init a Linear(+BN) stack and fold each eval-mode BN affine into the
    NEXT linear:  W'[i+1] = diag(s_i) @ W[i+1],  b'[i+1] = b[i+1] + t_i @ W[i+1]."""
    n = len(dims)
    keys = jax.random.split(key, 2 * n)
    Ws, bs, scales, shifts = [], [], [], []
    for i, (fi, fo) in enumerate(dims):
        W, b = _init_linear(keys[2 * i], fi, fo)
        Ws.append(W)
        bs.append(b)
        if i < n_bn:
            s, t = _init_bn(keys[2 * i + 1], fo)
            scales.append(s)
            shifts.append(t)
    fW, fb = [Ws[0]], [bs[0]]
    for i in range(1, n):
        s, t = scales[i - 1], shifts[i - 1]
        fW.append(Ws[i] * s[:, None])
        fb.append(bs[i] + t @ Ws[i])
    return fW, fb


def _pad_w(W):
    fi, fo = W.shape
    return jnp.zeros((KROWS, PAD), jnp.float32).at[:fi, :fo].set(W)


def _pad_v(v):
    return jnp.zeros((PAD,), jnp.float32).at[:v.shape[0]].set(v)


def make_params(key):
    ke, kd, kc = jax.random.split(key, 3)
    encW, encB = _make_stack(ke, ENC_DIMS, N_ENC_BN)
    decW, decB = _make_stack(kd, DEC_DIMS, N_DEC_BN)
    Wc, bc = _init_linear(kc, LATENT, N_CLASSES)

    all_W = encW + [Wc] + decW
    all_b = encB + [bc] + decB
    W = jnp.stack([_pad_w(w) for w in all_W]).astype(jnp.bfloat16)  # (22,32,128)
    b = jnp.stack([_pad_v(v) for v in all_b])                        # (22,128) f32
    return dict(W=W, b=b)


# ------------------------------ wrapper ---------------------------------------
def ci_vae_forward(x, params):
    """x: (B, input_size) float32. Returns (x_hat, y_hat, mu, logvar, z)."""
    x = x.reshape(-1, INPUT_SIZE).astype(jnp.float32)
    B = x.shape[0]

    # Batch tile: round B up to a multiple of 8 (sublane), cap at 128 (MXU rows).
    TB = min(128, ((B + 7) // 8) * 8)
    Bpad = ((B + TB - 1) // TB) * TB
    ntiles = Bpad // TB

    x_pad = jnp.zeros((Bpad, PAD), jnp.float32).at[:B, :INPUT_SIZE].set(x)

    out = pl.pallas_call(
        ci_vae_kernel,
        out_shape=jax.ShapeDtypeStruct((3, Bpad, PAD), jnp.float32),
        grid=(ntiles,),
        in_specs=[
            pl.BlockSpec((TB, PAD), lambda i: (i, 0)),                  # x
            pl.BlockSpec((N_LAYERS, KROWS, PAD), lambda i: (0, 0, 0)),  # weights
            pl.BlockSpec((N_LAYERS, PAD), lambda i: (0, 0)),            # biases
        ],
        out_specs=pl.BlockSpec((3, TB, PAD), lambda i: (0, i, 0)),
        compiler_params=pltpu.CompilerParams(
            dimension_semantics=("parallel",)),
    )(x_pad, params["W"], params["b"])

    mulv = out[0, :B]
    mu = mulv[:, :LATENT]
    logvar = mulv[:, LATENT:2 * LATENT]
    z = mu                                    # eval-mode reparameterize
    y_hat = out[1, :B, :N_CLASSES]
    x_hat = out[2, :B, :INPUT_SIZE]
    return x_hat, y_hat, mu, logvar, z


# ------------------------------ pure-JAX reference ----------------------------
def ci_vae_reference(x, params):
    """Reference using the same folded / padded / bf16-stored parameters."""
    W = params["W"].astype(jnp.float32)       # (22, 32, 128)
    b = params["b"]                            # (22, 128)
    B = x.shape[0]

    def linear(h, idx):
        a = h[:, :KROWS].astype(jnp.bfloat16).astype(jnp.float32)
        return a @ W[idx] + b[idx]

    h = jnp.zeros((B, PAD), jnp.float32).at[:, :INPUT_SIZE].set(x)
    for i in range(N_ENC - 1):
        h = jnp.maximum(linear(h, i), 0.0)
    mulv = linear(h, N_ENC - 1)
    mu = mulv[:, :LATENT]
    logvar = mulv[:, LATENT:2 * LATENT]
    z = mu
    y_hat = linear(mulv, IDX_CLS)[:, :N_CLASSES]
    d = mulv
    for i in range(N_DEC - 1):
        d = jnp.maximum(linear(d, IDX_DEC + i), 0.0)
    x_hat = linear(d, IDX_DEC + N_DEC - 1)[:, :INPUT_SIZE]
    return x_hat, y_hat, mu, logvar, z


# ------------------------------ main -------------------------------------------
if __name__ == "__main__":
    key = jax.random.PRNGKey(0)
    kx, kp = jax.random.split(key)

    B = 2
    x = jax.random.normal(kx, (B, INPUT_SIZE), jnp.float32)
    params = make_params(kp)

    outs = jax.block_until_ready(ci_vae_forward(x, params))
    refs = ci_vae_reference(x, params)
    for o, r in zip(outs, refs):
        np.testing.assert_allclose(np.asarray(o), np.asarray(r),
                                   rtol=1e-3, atol=1e-3)

    print("KERNEL_OK")
</pallas_src>

<mosaic_0001>
module attributes {stable_mosaic.version = 11 : i64} {
  func.func @ci_vae_kernel(%arg0: i32, %arg1: memref<8x128xf32, #tpu.memory_space<vmem>>, %arg2: memref<21x32x128xbf16, #tpu.memory_space<vmem>>, %arg3: memref<21x128xf32, #tpu.memory_space<vmem>>, %arg4: memref<3x8x128xf32, #tpu.memory_space<vmem>>) attributes {dimension_semantics = [#tpu.dimension_semantics<parallel>], iteration_bounds = array<i64: 1>, scalar_prefetch = 0 : i64, scratch_operands = 0 : i64, tpu.core_type = #tpu.core_type<tc>, window_params = [{transform_indices = @transform_0, window_bounds = array<i64: 8, 128>}, {pipeline_mode = #tpu.pipeline_mode<synchronous>, transform_indices = @transform_1, window_bounds = array<i64: 21, 32, 128>}, {pipeline_mode = #tpu.pipeline_mode<synchronous>, transform_indices = @transform_2, window_bounds = array<i64: 21, 128>}, {transform_indices = @transform_3, window_bounds = array<i64: 3, 8, 128>}]} {
    %c0 = arith.constant 0 : index
    %c0_0 = arith.constant 0 : index
    %0 = vector.load %arg1[%c0, %c0_0] : memref<8x128xf32, #tpu.memory_space<vmem>>, vector<8x128xf32>
    %1 = vector.extract_strided_slice %0 {offsets = [0, 0], sizes = [8, 32], strides = [1, 1]} : vector<8x128xf32> to vector<8x32xf32>
    %2 = arith.truncf %1 : vector<8x32xf32> to vector<8x32xbf16>
    %c0_1 = arith.constant 0 : index
    %c0_2 = arith.constant 0 : index
    %c0_3 = arith.constant 0 : index
    %3 = vector.load %arg2[%c0_1, %c0_2, %c0_3] : memref<21x32x128xbf16, #tpu.memory_space<vmem>>, vector<1x32x128xbf16>
    %4 = vector.shape_cast %3 : vector<1x32x128xbf16> to vector<32x128xbf16>
    %cst = arith.constant dense<0.000000e+00> : vector<8x128xf32>
    %5 = tpu.matmul %2, %4, %cst {dimension_numbers = #tpu.dot_dimension_numbers<[1], [0], [0], [1], [0, 0, 1, 1], [], []>} : vector<8x32xbf16>, vector<32x128xbf16>, vector<8x128xf32> -> vector<8x128xf32>
    %c0_4 = arith.constant 0 : index
    %c0_5 = arith.constant 0 : index
    %6 = vector.load %arg3[%c0_4, %c0_5] : memref<21x128xf32, #tpu.memory_space<vmem>>, vector<1x128xf32>
    %7 = vector.broadcast %6 : vector<1x128xf32> to vector<8x128xf32>
    %8 = arith.addf %5, %7 : vector<8x128xf32>
    %cst_6 = arith.constant 0.000000e+00 : f32
    %9 = vector.broadcast %cst_6 : f32 to vector<8x128xf32>
    %10 = arith.maximumf %8, %9 : vector<8x128xf32>
    %11 = vector.extract_strided_slice %10 {offsets = [0, 0], sizes = [8, 32], strides = [1, 1]} : vector<8x128xf32> to vector<8x32xf32>
    %12 = arith.truncf %11 : vector<8x32xf32> to vector<8x32xbf16>
    %c1 = arith.constant 1 : index
    %c0_7 = arith.constant 0 : index
    %c0_8 = arith.constant 0 : index
    %13 = vector.load %arg2[%c1, %c0_7, %c0_8] : memref<21x32x128xbf16, #tpu.memory_space<vmem>>, vector<1x32x128xbf16>
    %14 = vector.shape_cast %13 : vector<1x32x128xbf16> to vector<32x128xbf16>
    %cst_9 = arith.constant dense<0.000000e+00> : vector<8x128xf32>
    %15 = tpu.matmul %12, %14, %cst_9 {dimension_numbers = #tpu.dot_dimension_numbers<[1], [0], [0], [1], [0, 0, 1, 1], [], []>} : vector<8x32xbf16>, vector<32x128xbf16>, vector<8x128xf32> -> vector<8x128xf32>
    %c1_10 = arith.constant 1 : index
    %c0_11 = arith.constant 0 : index
    %16 = vector.load %arg3[%c1_10, %c0_11] : memref<21x128xf32, #tpu.memory_space<vmem>>, vector<1x128xf32>
    %17 = vector.broadcast %16 : vector<1x128xf32> to vector<8x128xf32>
    %18 = arith.addf %15, %17 : vector<8x128xf32>
    %cst_12 = arith.constant 0.000000e+00 : f32
    %19 = vector.broadcast %cst_12 : f32 to vector<8x128xf32>
    %20 = arith.maximumf %18, %19 : vector<8x128xf32>
    %21 = vector.extract_strided_slice %20 {offsets = [0, 0], sizes = [8, 32], strides = [1, 1]} : vector<8x128xf32> to vector<8x32xf32>
    %22 = arith.truncf %21 : vector<8x32xf32> to vector<8x32xbf16>
    %c2 = arith.constant 2 : index
    %c0_13 = arith.constant 0 : index
    %c0_14 = arith.constant 0 : index
    %23 = vector.load %arg2[%c2, %c0_13, %c0_14] : memref<21x32x128xbf16, #tpu.memory_space<vmem>>, vector<1x32x128xbf16>
    %24 = vector.shape_cast %23 : vector<1x32x128xbf16> to vector<32x128xbf16>
    %cst_15 = arith.constant dense<0.000000e+00> : vector<8x128xf32>
    %25 = tpu.matmul %22, %24, %cst_15 {dimension_numbers = #tpu.dot_dimension_numbers<[1], [0], [0], [1], [0, 0, 1, 1], [], []>} : vector<8x32xbf16>, vector<32x128xbf16>, vector<8x128xf32> -> vector<8x128xf32>
    %c2_16 = arith.constant 2 : index
    %c0_17 = arith.constant 0 : index
    %26 = vector.load %arg3[%c2_16, %c0_17] : memref<21x128xf32, #tpu.memory_space<vmem>>, vector<1x128xf32>
    %27 = vector.broadcast %26 : vector<1x128xf32> to vector<8x128xf32>
    %28 = arith.addf %25, %27 : vector<8x128xf32>
    %cst_18 = arith.constant 0.000000e+00 : f32
    %29 = vector.broadcast %cst_18 : f32 to vector<8x128xf32>
    %30 = arith.maximumf %28, %29 : vector<8x128xf32>
    %31 = vector.extract_strided_slice %30 {offsets = [0, 0], sizes = [8, 32], strides = [1, 1]} : vector<8x128xf32> to vector<8x32xf32>
    %32 = arith.truncf %31 : vector<8x32xf32> to vector<8x32xbf16>
    %c3 = arith.constant 3 : index
    %c0_19 = arith.constant 0 : index
    %c0_20 = arith.constant 0 : index
    %33 = vector.load %arg2[%c3, %c0_19, %c0_20] : memref<21x32x128xbf16, #tpu.memory_space<vmem>>, vector<1x32x128xbf16>
    %34 = vector.shape_cast %33 : vector<1x32x128xbf16> to vector<32x128xbf16>
    %cst_21 = arith.constant dense<0.000000e+00> : vector<8x128xf32>
    %35 = tpu.matmul %32, %34, %cst_21 {dimension_numbers = #tpu.dot_dimension_numbers<[1], [0], [0], [1], [0, 0, 1, 1], [], []>} : vector<8x32xbf16>, vector<32x128xbf16>, vector<8x128xf32> -> vector<8x128xf32>
    %c3_22 = arith.constant 3 : index
    %c0_23 = arith.constant 0 : index
    %36 = vector.load %arg3[%c3_22, %c0_23] : memref<21x128xf32, #tpu.memory_space<vmem>>, vector<1x128xf32>
    %37 = vector.broadcast %36 : vector<1x128xf32> to vector<8x128xf32>
    %38 = arith.addf %35, %37 : vector<8x128xf32>
    %cst_24 = arith.constant 0.000000e+00 : f32
    %39 = vector.broadcast %cst_24 : f32 to vector<8x128xf32>
    %40 = arith.maximumf %38, %39 : vector<8x128xf32>
    %41 = vector.extract_strided_slice %40 {offsets = [0, 0], sizes = [8, 32], strides = [1, 1]} : vector<8x128xf32> to vector<8x32xf32>
    %42 = arith.truncf %41 : vector<8x32xf32> to vector<8x32xbf16>
    %c4 = arith.constant 4 : index
    %c0_25 = arith.constant 0 : index
    %c0_26 = arith.constant 0 : index
    %43 = vector.load %arg2[%c4, %c0_25, %c0_26] : memref<21x32x128xbf16, #tpu.memory_space<vmem>>, vector<1x32x128xbf16>
    %44 = vector.shape_cast %43 : vector<1x32x128xbf16> to vector<32x128xbf16>
    %cst_27 = arith.constant dense<0.000000e+00> : vector<8x128xf32>
    %45 = tpu.matmul %42, %44, %cst_27 {dimension_numbers = #tpu.dot_dimension_numbers<[1], [0], [0], [1], [0, 0, 1, 1], [], []>} : vector<8x32xbf16>, vector<32x128xbf16>, vector<8x128xf32> -> vector<8x128xf32>
    %c4_28 = arith.constant 4 : index
    %c0_29 = arith.constant 0 : index
    %46 = vector.load %arg3[%c4_28, %c0_29] : memref<21x128xf32, #tpu.memory_space<vmem>>, vector<1x128xf32>
    %47 = vector.broadcast %46 : vector<1x128xf32> to vector<8x128xf32>
    %48 = arith.addf %45, %47 : vector<8x128xf32>
    %cst_30 = arith.constant 0.000000e+00 : f32
    %49 = vector.broadcast %cst_30 : f32 to vector<8x128xf32>
    %50 = arith.maximumf %48, %49 : vector<8x128xf32>
    %51 = vector.extract_strided_slice %50 {offsets = [0, 0], sizes = [8, 32], strides = [1, 1]} : vector<8x128xf32> to vector<8x32xf32>
    %52 = arith.truncf %51 : vector<8x32xf32> to vector<8x32xbf16>
    %c5 = arith.constant 5 : index
    %c0_31 = arith.constant 0 : index
    %c0_32 = arith.constant 0 : index
    %53 = vector.load %arg2[%c5, %c0_31, %c0_32] : memref<21x32x128xbf16, #tpu.memory_space<vmem>>, vector<1x32x128xbf16>
    %54 = vector.shape_cast %53 : vector<1x32x128xbf16> to vector<32x128xbf16>
    %cst_33 = arith.constant dense<0.000000e+00> : vector<8x128xf32>
    %55 = tpu.matmul %52, %54, %cst_33 {dimension_numbers = #tpu.dot_dimension_numbers<[1], [0], [0], [1], [0, 0, 1, 1], [], []>} : vector<8x32xbf16>, vector<32x128xbf16>, vector<8x128xf32> -> vector<8x128xf32>
    %c5_34 = arith.constant 5 : index
    %c0_35 = arith.constant 0 : index
    %56 = vector.load %arg3[%c5_34, %c0_35] : memref<21x128xf32, #tpu.memory_space<vmem>>, vector<1x128xf32>
    %57 = vector.broadcast %56 : vector<1x128xf32> to vector<8x128xf32>
    %58 = arith.addf %55, %57 : vector<8x128xf32>
    %cst_36 = arith.constant 0.000000e+00 : f32
    %59 = vector.broadcast %cst_36 : f32 to vector<8x128xf32>
    %60 = arith.maximumf %58, %59 : vector<8x128xf32>
    %61 = vector.extract_strided_slice %60 {offsets = [0, 0], sizes = [8, 32], strides = [1, 1]} : vector<8x128xf32> to vector<8x32xf32>
    %62 = arith.truncf %61 : vector<8x32xf32> to vector<8x32xbf16>
    %c6 = arith.constant 6 : index
    %c0_37 = arith.constant 0 : index
    %c0_38 = arith.constant 0 : index
    %63 = vector.load %arg2[%c6, %c0_37, %c0_38] : memref<21x32x128xbf16, #tpu.memory_space<vmem>>, vector<1x32x128xbf16>
    %64 = vector.shape_cast %63 : vector<1x32x128xbf16> to vector<32x128xbf16>
    %cst_39 = arith.constant dense<0.000000e+00> : vector<8x128xf32>
    %65 = tpu.matmul %62, %64, %cst_39 {dimension_numbers = #tpu.dot_dimension_numbers<[1], [0], [0], [1], [0, 0, 1, 1], [], []>} : vector<8x32xbf16>, vector<32x128xbf16>, vector<8x128xf32> -> vector<8x128xf32>
    %c6_40 = arith.constant 6 : index
    %c0_41 = arith.constant 0 : index
    %66 = vector.load %arg3[%c6_40, %c0_41] : memref<21x128xf32, #tpu.memory_space<vmem>>, vector<1x128xf32>
    %67 = vector.broadcast %66 : vector<1x128xf32> to vector<8x128xf32>
    %68 = arith.addf %65, %67 : vector<8x128xf32>
    %cst_42 = arith.constant 0.000000e+00 : f32
    %69 = vector.broadcast %cst_42 : f32 to vector<8x128xf32>
    %70 = arith.maximumf %68, %69 : vector<8x128xf32>
    %71 = vector.extract_strided_slice %70 {offsets = [0, 0], sizes = [8, 32], strides = [1, 1]} : vector<8x128xf32> to vector<8x32xf32>
    %72 = arith.truncf %71 : vector<8x32xf32> to vector<8x32xbf16>
    %c7 = arith.constant 7 : index
    %c0_43 = arith.constant 0 : index
    %c0_44 = arith.constant 0 : index
    %73 = vector.load %arg2[%c7, %c0_43, %c0_44] : memref<21x32x128xbf16, #tpu.memory_space<vmem>>, vector<1x32x128xbf16>
    %74 = vector.shape_cast %73 : vector<1x32x128xbf16> to vector<32x128xbf16>
    %cst_45 = arith.constant dense<0.000000e+00> : vector<8x128xf32>
    %75 = tpu.matmul %72, %74, %cst_45 {dimension_numbers = #tpu.dot_dimension_numbers<[1], [0], [0], [1], [0, 0, 1, 1], [], []>} : vector<8x32xbf16>, vector<32x128xbf16>, vector<8x128xf32> -> vector<8x128xf32>
    %c7_46 = arith.constant 7 : index
    %c0_47 = arith.constant 0 : index
    %76 = vector.load %arg3[%c7_46, %c0_47] : memref<21x128xf32, #tpu.memory_space<vmem>>, vector<1x128xf32>
    %77 = vector.broadcast %76 : vector<1x128xf32> to vector<8x128xf32>
    %78 = arith.addf %75, %77 : vector<8x128xf32>
    %cst_48 = arith.constant 0.000000e+00 : f32
    %79 = vector.broadcast %cst_48 : f32 to vector<8x128xf32>
    %80 = arith.maximumf %78, %79 : vector<8x128xf32>
    %81 = vector.extract_strided_slice %80 {offsets = [0, 0], sizes = [8, 32], strides = [1, 1]} : vector<8x128xf32> to vector<8x32xf32>
    %82 = arith.truncf %81 : vector<8x32xf32> to vector<8x32xbf16>
    %c8 = arith.constant 8 : index
    %c0_49 = arith.constant 0 : index
    %c0_50 = arith.constant 0 : index
    %83 = vector.load %arg2[%c8, %c0_49, %c0_50] : memref<21x32x128xbf16, #tpu.memory_space<vmem>>, vector<1x32x128xbf16>
    %84 = vector.shape_cast %83 : vector<1x32x128xbf16> to vector<32x128xbf16>
    %cst_51 = arith.constant dense<0.000000e+00> : vector<8x128xf32>
    %85 = tpu.matmul %82, %84, %cst_51 {dimension_numbers = #tpu.dot_dimension_numbers<[1], [0], [0], [1], [0, 0, 1, 1], [], []>} : vector<8x32xbf16>, vector<32x128xbf16>, vector<8x128xf32> -> vector<8x128xf32>
    %c8_52 = arith.constant 8 : index
    %c0_53 = arith.constant 0 : index
    %86 = vector.load %arg3[%c8_52, %c0_53] : memref<21x128xf32, #tpu.memory_space<vmem>>, vector<1x128xf32>
    %87 = vector.broadcast %86 : vector<1x128xf32> to vector<8x128xf32>
    %88 = arith.addf %85, %87 : vector<8x128xf32>
    %cst_54 = arith.constant 0.000000e+00 : f32
    %89 = vector.broadcast %cst_54 : f32 to vector<8x128xf32>
    %90 = arith.maximumf %88, %89 : vector<8x128xf32>
    %91 = vector.extract_strided_slice %90 {offsets = [0, 0], sizes = [8, 32], strides = [1, 1]} : vector<8x128xf32> to vector<8x32xf32>
    %92 = arith.truncf %91 : vector<8x32xf32> to vector<8x32xbf16>
    %c9 = arith.constant 9 : index
    %c0_55 = arith.constant 0 : index
    %c0_56 = arith.constant 0 : index
    %93 = vector.load %arg2[%c9, %c0_55, %c0_56] : memref<21x32x128xbf16, #tpu.memory_space<vmem>>, vector<1x32x128xbf16>
    %94 = vector.shape_cast %93 : vector<1x32x128xbf16> to vector<32x128xbf16>
    %cst_57 = arith.constant dense<0.000000e+00> : vector<8x128xf32>
    %95 = tpu.matmul %92, %94, %cst_57 {dimension_numbers = #tpu.dot_dimension_numbers<[1], [0], [0], [1], [0, 0, 1, 1], [], []>} : vector<8x32xbf16>, vector<32x128xbf16>, vector<8x128xf32> -> vector<8x128xf32>
    %c9_58 = arith.constant 9 : index
    %c0_59 = arith.constant 0 : index
    %96 = vector.load %arg3[%c9_58, %c0_59] : memref<21x128xf32, #tpu.memory_space<vmem>>, vector<1x128xf32>
    %97 = vector.broadcast %96 : vector<1x128xf32> to vector<8x128xf32>
    %98 = arith.addf %95, %97 : vector<8x128xf32>
    %c0_60 = arith.constant 0 : index
    %c0_61 = arith.constant 0 : index
    %c0_62 = arith.constant 0 : index
    %99 = vector.load %arg4[%c0_60, %c0_61, %c0_62] : memref<3x8x128xf32, #tpu.memory_space<vmem>>, vector<1x8x128xf32>
    %100 = vector.shape_cast %99 : vector<1x8x128xf32> to vector<8x128xf32>
    %101 = vector.shape_cast %98 : vector<8x128xf32> to vector<1x8x128xf32>
    tpu.vector_store %arg4[%c0_60, %c0_61, %c0_62], %101 {strides = array<i32>} : memref<3x8x128xf32, #tpu.memory_space<vmem>>, vector<1x8x128xf32>,
    %102 = vector.extract_strided_slice %98 {offsets = [0, 0], sizes = [8, 32], strides = [1, 1]} : vector<8x128xf32> to vector<8x32xf32>
    %103 = arith.truncf %102 : vector<8x32xf32> to vector<8x32xbf16>
    %c10 = arith.constant 10 : index
    %c0_63 = arith.constant 0 : index
    %c0_64 = arith.constant 0 : index
    %104 = vector.load %arg2[%c10, %c0_63, %c0_64] : memref<21x32x128xbf16, #tpu.memory_space<vmem>>, vector<1x32x128xbf16>
    %105 = vector.shape_cast %104 : vector<1x32x128xbf16> to vector<32x128xbf16>
    %cst_65 = arith.constant dense<0.000000e+00> : vector<8x128xf32>
    %106 = tpu.matmul %103, %105, %cst_65 {dimension_numbers = #tpu.dot_dimension_numbers<[1], [0], [0], [1], [0, 0, 1, 1], [], []>} : vector<8x32xbf16>, vector<32x128xbf16>, vector<8x128xf32> -> vector<8x128xf32>
    %c10_66 = arith.constant 10 : index
    %c0_67 = arith.constant 0 : index
    %107 = vector.load %arg3[%c10_66, %c0_67] : memref<21x128xf32, #tpu.memory_space<vmem>>, vector<1x128xf32>
    %108 = vector.broadcast %107 : vector<1x128xf32> to vector<8x128xf32>
    %109 = arith.addf %106, %108 : vector<8x128xf32>
    %c1_68 = arith.constant 1 : index
    %c0_69 = arith.constant 0 : index
    %c0_70 = arith.constant 0 : index
    %110 = vector.load %arg4[%c1_68, %c0_69, %c0_70] : memref<3x8x128xf32, #tpu.memory_space<vmem>>, vector<1x8x128xf32>
    %111 = vector.shape_cast %110 : vector<1x8x128xf32> to vector<8x128xf32>
    %112 = vector.shape_cast %109 : vector<8x128xf32> to vector<1x8x128xf32>
    tpu.vector_store %arg4[%c1_68, %c0_69, %c0_70], %112 {strides = array<i32>} : memref<3x8x128xf32, #tpu.memory_space<vmem>>, vector<1x8x128xf32>,
    %113 = vector.extract_strided_slice %98 {offsets = [0, 0], sizes = [8, 32], strides = [1, 1]} : vector<8x128xf32> to vector<8x32xf32>
    %114 = arith.truncf %113 : vector<8x32xf32> to vector<8x32xbf16>
    %c11 = arith.constant 11 : index
    %c0_71 = arith.constant 0 : index
    %c0_72 = arith.constant 0 : index
    %115 = vector.load %arg2[%c11, %c0_71, %c0_72] : memref<21x32x128xbf16, #tpu.memory_space<vmem>>, vector<1x32x128xbf16>
    %116 = vector.shape_cast %115 : vector<1x32x128xbf16> to vector<32x128xbf16>
    %cst_73 = arith.constant dense<0.000000e+00> : vector<8x128xf32>
    %117 = tpu.matmul %114, %116, %cst_73 {dimension_numbers = #tpu.dot_dimension_numbers<[1], [0], [0], [1], [0, 0, 1, 1], [], []>} : vector<8x32xbf16>, vector<32x128xbf16>, vector<8x128xf32> -> vector<8x128xf32>
    %c11_74 = arith.constant 11 : index
    %c0_75 = arith.constant 0 : index
    %118 = vector.load %arg3[%c11_74, %c0_75] : memref<21x128xf32, #tpu.memory_space<vmem>>, vector<1x128xf32>
    %119 = vector.broadcast %118 : vector<1x128xf32> to vector<8x128xf32>
    %120 = arith.addf %117, %119 : vector<8x128xf32>
    %cst_76 = arith.constant 0.000000e+00 : f32
    %121 = vector.broadcast %cst_76 : f32 to vector<8x128xf32>
    %122 = arith.maximumf %120, %121 : vector<8x128xf32>
    %123 = vector.extract_strided_slice %122 {offsets = [0, 0], sizes = [8, 32], strides = [1, 1]} : vector<8x128xf32> to vector<8x32xf32>
    %124 = arith.truncf %123 : vector<8x32xf32> to vector<8x32xbf16>
    %c12 = arith.constant 12 : index
    %c0_77 = arith.constant 0 : index
    %c0_78 = arith.constant 0 : index
    %125 = vector.load %arg2[%c12, %c0_77, %c0_78] : memref<21x32x128xbf16, #tpu.memory_space<vmem>>, vector<1x32x128xbf16>
    %126 = vector.shape_cast %125 : vector<1x32x128xbf16> to vector<32x128xbf16>
    %cst_79 = arith.constant dense<0.000000e+00> : vector<8x128xf32>
    %127 = tpu.matmul %124, %126, %cst_79 {dimension_numbers = #tpu.dot_dimension_numbers<[1], [0], [0], [1], [0, 0, 1, 1], [], []>} : vector<8x32xbf16>, vector<32x128xbf16>, vector<8x128xf32> -> vector<8x128xf32>
    %c12_80 = arith.constant 12 : index
    %c0_81 = arith.constant 0 : index
    %128 = vector.load %arg3[%c12_80, %c0_81] : memref<21x128xf32, #tpu.memory_space<vmem>>, vector<1x128xf32>
    %129 = vector.broadcast %128 : vector<1x128xf32> to vector<8x128xf32>
    %130 = arith.addf %127, %129 : vector<8x128xf32>
    %cst_82 = arith.constant 0.000000e+00 : f32
    %131 = vector.broadcast %cst_82 : f32 to vector<8x128xf32>
    %132 = arith.maximumf %130, %131 : vector<8x128xf32>
    %133 = vector.extract_strided_slice %132 {offsets = [0, 0], sizes = [8, 32], strides = [1, 1]} : vector<8x128xf32> to vector<8x32xf32>
    %134 = arith.truncf %133 : vector<8x32xf32> to vector<8x32xbf16>
    %c13 = arith.constant 13 : index
    %c0_83 = arith.constant 0 : index
    %c0_84 = arith.constant 0 : index
    %135 = vector.load %arg2[%c13, %c0_83, %c0_84] : memref<21x32x128xbf16, #tpu.memory_space<vmem>>, vector<1x32x128xbf16>
    %136 = vector.shape_cast %135 : vector<1x32x128xbf16> to vector<32x128xbf16>
    %cst_85 = arith.constant dense<0.000000e+00> : vector<8x128xf32>
    %137 = tpu.matmul %134, %136, %cst_85 {dimension_numbers = #tpu.dot_dimension_numbers<[1], [0], [0], [1], [0, 0, 1, 1], [], []>} : vector<8x32xbf16>, vector<32x128xbf16>, vector<8x128xf32> -> vector<8x128xf32>
    %c13_86 = arith.constant 13 : index
    %c0_87 = arith.constant 0 : index
    %138 = vector.load %arg3[%c13_86, %c0_87] : memref<21x128xf32, #tpu.memory_space<vmem>>, vector<1x128xf32>
    %139 = vector.broadcast %138 : vector<1x128xf32> to vector<8x128xf32>
    %140 = arith.addf %137, %139 : vector<8x128xf32>
    %cst_88 = arith.constant 0.000000e+00 : f32
    %141 = vector.broadcast %cst_88 : f32 to vector<8x128xf32>
    %142 = arith.maximumf %140, %141 : vector<8x128xf32>
    %143 = vector.extract_strided_slice %142 {offsets = [0, 0], sizes = [8, 32], strides = [1, 1]} : vector<8x128xf32> to vector<8x32xf32>
    %144 = arith.truncf %143 : vector<8x32xf32> to vector<8x32xbf16>
    %c14 = arith.constant 14 : index
    %c0_89 = arith.constant 0 : index
    %c0_90 = arith.constant 0 : index
    %145 = vector.load %arg2[%c14, %c0_89, %c0_90] : memref<21x32x128xbf16, #tpu.memory_space<vmem>>, vector<1x32x128xbf16>
    %146 = vector.shape_cast %145 : vector<1x32x128xbf16> to vector<32x128xbf16>
    %cst_91 = arith.constant dense<0.000000e+00> : vector<8x128xf32>
    %147 = tpu.matmul %144, %146, %cst_91 {dimension_numbers = #tpu.dot_dimension_numbers<[1], [0], [0], [1], [0, 0, 1, 1], [], []>} : vector<8x32xbf16>, vector<32x128xbf16>, vector<8x128xf32> -> vector<8x128xf32>
    %c14_92 = arith.constant 14 : index
    %c0_93 = arith.constant 0 : index
    %148 = vector.load %arg3[%c14_92, %c0_93] : memref<21x128xf32, #tpu.memory_space<vmem>>, vector<1x128xf32>
    %149 = vector.broadcast %148 : vector<1x128xf32> to vector<8x128xf32>
    %150 = arith.addf %147, %149 : vector<8x128xf32>
    %cst_94 = arith.constant 0.000000e+00 : f32
    %151 = vector.broadcast %cst_94 : f32 to vector<8x128xf32>
    %152 = arith.maximumf %150, %151 : vector<8x128xf32>
    %153 = vector.extract_strided_slice %152 {offsets = [0, 0], sizes = [8, 32], strides = [1, 1]} : vector<8x128xf32> to vector<8x32xf32>
    %154 = arith.truncf %153 : vector<8x32xf32> to vector<8x32xbf16>
    %c15 = arith.constant 15 : index
    %c0_95 = arith.constant 0 : index
    %c0_96 = arith.constant 0 : index
    %155 = vector.load %arg2[%c15, %c0_95, %c0_96] : memref<21x32x128xbf16, #tpu.memory_space<vmem>>, vector<1x32x128xbf16>
    %156 = vector.shape_cast %155 : vector<1x32x128xbf16> to vector<32x128xbf16>
    %cst_97 = arith.constant dense<0.000000e+00> : vector<8x128xf32>
    %157 = tpu.matmul %154, %156, %cst_97 {dimension_numbers = #tpu.dot_dimension_numbers<[1], [0], [0], [1], [0, 0, 1, 1], [], []>} : vector<8x32xbf16>, vector<32x128xbf16>, vector<8x128xf32> -> vector<8x128xf32>
    %c15_98 = arith.constant 15 : index
    %c0_99 = arith.constant 0 : index
    %158 = vector.load %arg3[%c15_98, %c0_99] : memref<21x128xf32, #tpu.memory_space<vmem>>, vector<1x128xf32>
    %159 = vector.broadcast %158 : vector<1x128xf32> to vector<8x128xf32>
    %160 = arith.addf %157, %159 : vector<8x128xf32>
    %cst_100 = arith.constant 0.000000e+00 : f32
    %161 = vector.broadcast %cst_100 : f32 to vector<8x128xf32>
    %162 = arith.maximumf %160, %161 : vector<8x128xf32>
    %163 = vector.extract_strided_slice %162 {offsets = [0, 0], sizes = [8, 32], strides = [1, 1]} : vector<8x128xf32> to vector<8x32xf32>
    %164 = arith.truncf %163 : vector<8x32xf32> to vector<8x32xbf16>
    %c16 = arith.constant 16 : index
    %c0_101 = arith.constant 0 : index
    %c0_102 = arith.constant 0 : index
    %165 = vector.load %arg2[%c16, %c0_101, %c0_102] : memref<21x32x128xbf16, #tpu.memory_space<vmem>>, vector<1x32x128xbf16>
    %166 = vector.shape_cast %165 : vector<1x32x128xbf16> to vector<32x128xbf16>
    %cst_103 = arith.constant dense<0.000000e+00> : vector<8x128xf32>
    %167 = tpu.matmul %164, %166, %cst_103 {dimension_numbers = #tpu.dot_dimension_numbers<[1], [0], [0], [1], [0, 0, 1, 1], [], []>} : vector<8x32xbf16>, vector<32x128xbf16>, vector<8x128xf32> -> vector<8x128xf32>
    %c16_104 = arith.constant 16 : index
    %c0_105 = arith.constant 0 : index
    %168 = vector.load %arg3[%c16_104, %c0_105] : memref<21x128xf32, #tpu.memory_space<vmem>>, vector<1x128xf32>
    %169 = vector.broadcast %168 : vector<1x128xf32> to vector<8x128xf32>
    %170 = arith.addf %167, %169 : vector<8x128xf32>
    %cst_106 = arith.constant 0.000000e+00 : f32
    %171 = vector.broadcast %cst_106 : f32 to vector<8x128xf32>
    %172 = arith.maximumf %170, %171 : vector<8x128xf32>
    %173 = vector.extract_strided_slice %172 {offsets = [0, 0], sizes = [8, 32], strides = [1, 1]} : vector<8x128xf32> to vector<8x32xf32>
    %174 = arith.truncf %173 : vector<8x32xf32> to vector<8x32xbf16>
    %c17 = arith.constant 17 : index
    %c0_107 = arith.constant 0 : index
    %c0_108 = arith.constant 0 : index
    %175 = vector.load %arg2[%c17, %c0_107, %c0_108] : memref<21x32x128xbf16, #tpu.memory_space<vmem>>, vector<1x32x128xbf16>
    %176 = vector.shape_cast %175 : vector<1x32x128xbf16> to vector<32x128xbf16>
    %cst_109 = arith.constant dense<0.000000e+00> : vector<8x128xf32>
    %177 = tpu.matmul %174, %176, %cst_109 {dimension_numbers = #tpu.dot_dimension_numbers<[1], [0], [0], [1], [0, 0, 1, 1], [], []>} : vector<8x32xbf16>, vector<32x128xbf16>, vector<8x128xf32> -> vector<8x128xf32>
    %c17_110 = arith.constant 17 : index
    %c0_111 = arith.constant 0 : index
    %178 = vector.load %arg3[%c17_110, %c0_111] : memref<21x128xf32, #tpu.memory_space<vmem>>, vector<1x128xf32>
    %179 = vector.broadcast %178 : vector<1x128xf32> to vector<8x128xf32>
    %180 = arith.addf %177, %179 : vector<8x128xf32>
    %cst_112 = arith.constant 0.000000e+00 : f32
    %181 = vector.broadcast %cst_112 : f32 to vector<8x128xf32>
    %182 = arith.maximumf %180, %181 : vector<8x128xf32>
    %183 = vector.extract_strided_slice %182 {offsets = [0, 0], sizes = [8, 32], strides = [1, 1]} : vector<8x128xf32> to vector<8x32xf32>
    %184 = arith.truncf %183 : vector<8x32xf32> to vector<8x32xbf16>
    %c18 = arith.constant 18 : index
    %c0_113 = arith.constant 0 : index
    %c0_114 = arith.constant 0 : index
    %185 = vector.load %arg2[%c18, %c0_113, %c0_114] : memref<21x32x128xbf16, #tpu.memory_space<vmem>>, vector<1x32x128xbf16>
    %186 = vector.shape_cast %185 : vector<1x32x128xbf16> to vector<32x128xbf16>
    %cst_115 = arith.constant dense<0.000000e+00> : vector<8x128xf32>
    %187 = tpu.matmul %184, %186, %cst_115 {dimension_numbers = #tpu.dot_dimension_numbers<[1], [0], [0], [1], [0, 0, 1, 1], [], []>} : vector<8x32xbf16>, vector<32x128xbf16>, vector<8x128xf32> -> vector<8x128xf32>
    %c18_116 = arith.constant 18 : index
    %c0_117 = arith.constant 0 : index
    %188 = vector.load %arg3[%c18_116, %c0_117] : memref<21x128xf32, #tpu.memory_space<vmem>>, vector<1x128xf32>
    %189 = vector.broadcast %188 : vector<1x128xf32> to vector<8x128xf32>
    %190 = arith.addf %187, %189 : vector<8x128xf32>
    %cst_118 = arith.constant 0.000000e+00 : f32
    %191 = vector.broadcast %cst_118 : f32 to vector<8x128xf32>
    %192 = arith.maximumf %190, %191 : vector<8x128xf32>
    %193 = vector.extract_strided_slice %192 {offsets = [0, 0], sizes = [8, 32], strides = [1, 1]} : vector<8x128xf32> to vector<8x32xf32>
    %194 = arith.truncf %193 : vector<8x32xf32> to vector<8x32xbf16>
    %c19 = arith.constant 19 : index
    %c0_119 = arith.constant 0 : index
    %c0_120 = arith.constant 0 : index
    %195 = vector.load %arg2[%c19, %c0_119, %c0_120] : memref<21x32x128xbf16, #tpu.memory_space<vmem>>, vector<1x32x128xbf16>
    %196 = vector.shape_cast %195 : vector<1x32x128xbf16> to vector<32x128xbf16>
    %cst_121 = arith.constant dense<0.000000e+00> : vector<8x128xf32>
    %197 = tpu.matmul %194, %196, %cst_121 {dimension_numbers = #tpu.dot_dimension_numbers<[1], [0], [0], [1], [0, 0, 1, 1], [], []>} : vector<8x32xbf16>, vector<32x128xbf16>, vector<8x128xf32> -> vector<8x128xf32>
    %c19_122 = arith.constant 19 : index
    %c0_123 = arith.constant 0 : index
    %198 = vector.load %arg3[%c19_122, %c0_123] : memref<21x128xf32, #tpu.memory_space<vmem>>, vector<1x128xf32>
    %199 = vector.broadcast %198 : vector<1x128xf32> to vector<8x128xf32>
    %200 = arith.addf %197, %199 : vector<8x128xf32>
    %cst_124 = arith.constant 0.000000e+00 : f32
    %201 = vector.broadcast %cst_124 : f32 to vector<8x128xf32>
    %202 = arith.maximumf %200, %201 : vector<8x128xf32>
    %203 = vector.extract_strided_slice %202 {offsets = [0, 0], sizes = [8, 32], strides = [1, 1]} : vector<8x128xf32> to vector<8x32xf32>
    %204 = arith.truncf %203 : vector<8x32xf32> to vector<8x32xbf16>
    %c20 = arith.constant 20 : index
    %c0_125 = arith.constant 0 : index
    %c0_126 = arith.constant 0 : index
    %205 = vector.load %arg2[%c20, %c0_125, %c0_126] : memref<21x32x128xbf16, #tpu.memory_space<vmem>>, vector<1x32x128xbf16>
    %206 = vector.shape_cast %205 : vector<1x32x128xbf16> to vector<32x128xbf16>
    %cst_127 = arith.constant dense<0.000000e+00> : vector<8x128xf32>
    %207 = tpu.matmul %204, %206, %cst_127 {dimension_numbers = #tpu.dot_dimension_numbers<[1], [0], [0], [1], [0, 0, 1, 1], [], []>} : vector<8x32xbf16>, vector<32x128xbf16>, vector<8x128xf32> -> vector<8x128xf32>
    %c20_128 = arith.constant 20 : index
    %c0_129 = arith.constant 0 : index
    %208 = vector.load %arg3[%c20_128, %c0_129] : memref<21x128xf32, #tpu.memory_space<vmem>>, vector<1x128xf32>
    %209 = vector.broadcast %208 : vector<1x128xf32> to vector<8x128xf32>
    %210 = arith.addf %207, %209 : vector<8x128xf32>
    %c2_130 = arith.constant 2 : index
    %c0_131 = arith.constant 0 : index
    %c0_132 = arith.constant 0 : index
    %211 = vector.load %arg4[%c2_130, %c0_131, %c0_132] : memref<3x8x128xf32, #tpu.memory_space<vmem>>, vector<1x8x128xf32>
    %212 = vector.shape_cast %211 : vector<1x8x128xf32> to vector<8x128xf32>
    %213 = vector.shape_cast %210 : vector<8x128xf32> to vector<1x8x128xf32>
    tpu.vector_store %arg4[%c2_130, %c0_131, %c0_132], %213 {strides = array<i32>} : memref<3x8x128xf32, #tpu.memory_space<vmem>>, vector<1x8x128xf32>,
    return
  }
  func.func @transform_0(%arg0: i32) -> (i32, i32) {
    %c0_i32 = arith.constant 0 : i32
    %c0_i32_0 = arith.constant 0 : i32
    return %arg0, %c0_i32 : i32, i32
  }
  func.func @transform_1(%arg0: i32) -> (i32, i32, i32) {
    %c0_i32 = arith.constant 0 : i32
    %c0_i32_0 = arith.constant 0 : i32
    %c0_i32_1 = arith.constant 0 : i32
    %c0_i32_2 = arith.constant 0 : i32
    return %c0_i32, %c0_i32_0, %c0_i32_1 : i32, i32, i32
  }
  func.func @transform_2(%arg0: i32) -> (i32, i32) {
    %c0_i32 = arith.constant 0 : i32
    %c0_i32_0 = arith.constant 0 : i32
    %c0_i32_1 = arith.constant 0 : i32
    return %c0_i32, %c0_i32_0 : i32, i32
  }
  func.func @transform_3(%arg0: i32) -> (i32, i32, i32) {
    %c0_i32 = arith.constant 0 : i32
    %c0_i32_0 = arith.constant 0 : i32
    %c0_i32_1 = arith.constant 0 : i32
    return %c0_i32, %arg0, %c0_i32_0 : i32, i32, i32
  }
}

</mosaic_0001>

<bundles_post_ra>
// kernel: tpu_custom_call.1
= control target key start
LH: loop header
LB: loop body
LE: loop exit
PB: predicated region body
PF: predicated region fallthrough
CT: control target
= control target key end

     0   :  { %8 = vsyncpa [#allocation3], 0  ;;  %s2129_s0 = inlined_call_operand.hbm [shape: f32[8,128], index: 0, kind: input, shape index: {}]   ;;  %s2130_s1 = inlined_call_operand.hbm [shape: bf16[21,32,128], index: 1, kind: input, shape index: {}]   ;;  %s2131_s2 = inlined_call_operand.hbm [shape: f32[21,128], index: 2, kind: input, shape index: {}]   ;;  %s2132_s3 = inlined_call_operand.hbm [shape: f32[3,8,128], index: 3, kind: output, shape index: {}]  }
   0x1   :  { %9 = vsyncpa [#allocation6], 0 }
   0x2   :  { %10 = vsyncpa [#allocation4], 0  ;;  %s1940_s12 = smov [#allocation5]   ;;  %s1846_s16 = scalar_lea.hbm %s2130_s1, 5376 }
   0x3   :  { %s26_s13 = sshll.u32 %s1940_s12, 4  ;;  %p1847_p0 = scmp.ne.s32.totalorder %s2130_s1, %s1846_s16  ;;  %s27_s13 = int_to_ptr.vmem [resolvable:$true] %s26_s13 }
   0x4   :  { %p1850_p1 = scmp.lt.u32.totalorder %s1846_s16, %s2130_s1 }
   0x6   :  { %p1852_p2 = pnand %p1850_p1, %p1847_p0 }
   0x8   :  { %1855 = shalt.err (!%p1852_p2)
}
   0x9   :  { %s1856_s21 = scalar_lea.vmem %s27_s13, 5376  ;;  %p1861_p4 = scmp.lt.s32.totalorder %s27_s13, %s27_s13 }
   0xa   :  { %p1857_p3 = scmp.ne.s32.totalorder %s27_s13, %s1856_s21  ;;  %p1862_p5 = scmp.lt.s32.totalorder %s1856_s21, %s1856_s21 }
   0xc   :  { %p1863_p6 = por %p1862_p5, %p1861_p4 }
   0xe   :  { %p1864_p7 = pnand %p1863_p6, %p1857_p3 }
  0x10   :  { %1867 = shalt.err (!%p1864_p7)
}
  0x11   :  { %s1941_s22 = smov 64   ;;  %s1942_s23 = smov 4  }
  0x12   :  { %32 = dma.hbm_to_vmem [thread:$0]  %s2130_s1, 5376, %s27_s13, [#allocation6], %s1941_s22, %s1941_s22, %s1942_s23  }
  0x13   :  { %s1943_s26 = smov [#allocation2]   ;;  %s1944_s28 = smov [#allocation7]  }
  0x14   :  { %s17_s27 = sshll.u32 %s1943_s26, 4  ;;  %s38_s29 = sshll.u32 %s1944_s28, 4  ;;  %s18_s27 = int_to_ptr.vmem [resolvable:$true] %s17_s27  ;;  %s39_s29 = int_to_ptr.vmem [resolvable:$true] %s38_s29 }
  0x15   :  { %s1868_s5 = scalar_lea.hbm %s2129_s0, 128 }
  0x16   :  { %p1869_p8 = scmp.ne.s32.totalorder %s2129_s0, %s1868_s5  ;;  %p1872_p9 = scmp.lt.u32.totalorder %s1868_s5, %s2129_s0 }
  0x18   :  { %p1874_p10 = pnand %p1872_p9, %p1869_p8 }
  0x1a   :  { %1877 = shalt.err (!%p1874_p10)
}
  0x1b   :  { %s1878_s1 = scalar_lea.vmem %s18_s27, 128  ;;  %p1883_p12 = scmp.lt.s32.totalorder %s18_s27, %s18_s27 }
  0x1c   :  { %p1879_p11 = scmp.ne.s32.totalorder %s18_s27, %s1878_s1  ;;  %p1884_p13 = scmp.lt.s32.totalorder %s1878_s1, %s1878_s1 }
  0x1e   :  { %p1885_p0 = por %p1884_p13, %p1883_p12 }
  0x20   :  { %p1886_p1 = pnand %p1885_p0, %p1879_p11 }
  0x22   :  { %1889 = shalt.err (!%p1886_p1)
}
  0x23   :  { %20 = dma.hbm_to_vmem [thread:$0]  %s2129_s0, 128, %s18_s27, [#allocation3]  }
  0x24   :  { %s1890_s14 = scalar_lea.hbm %s2131_s2, 384 }
  0x25   :  { %p1891_p2 = scmp.ne.s32.totalorder %s2131_s2, %s1890_s14  ;;  %p1894_p3 = scmp.lt.u32.totalorder %s1890_s14, %s2131_s2 }
  0x27   :  { %p1896_p4 = pnand %p1894_p3, %p1891_p2 }
  0x29   :  { %1899 = shalt.err (!%p1896_p4)
}
  0x2a   :  { %s1900_s19 = scalar_lea.vmem %s39_s29, 384  ;;  %p1905_p6 = scmp.lt.s32.totalorder %s39_s29, %s39_s29 }
  0x2b   :  { %p1901_p5 = scmp.ne.s32.totalorder %s39_s29, %s1900_s19  ;;  %p1906_p7 = scmp.lt.s32.totalorder %s1900_s19, %s1900_s19 }
  0x2d   :  { %p1907_p8 = por %p1906_p7, %p1905_p6 }
  0x2f   :  { %p1908_p9 = pnand %p1907_p8, %p1901_p5 }
  0x31   :  { %1911 = shalt.err (!%p1908_p9)
}
  0x32   :  { %s1945_s0 = smov 128   ;;  %s1946_s20 = smov 8  }
  0x33   :  { %44 = dma.hbm_to_vmem [thread:$0]  %s2131_s2, 384, %s39_s29, [#allocation6], %s1945_s0, %s1945_s0, %s1946_s20  }
  0x34   :  { %1934 = dma.done.wait [#allocation3], 128  }
  0x35   :  { %1935 = vsyncadd [#allocation3], 4294967168 }
  0x36   :  { %1936 = dma.done.wait [#allocation6], 5760  }
  0x37   :  { %1937 = vsyncadd [#allocation6], 4294961536  ;;  %v1947_v0 = vmov 0.0   ;;  %vm1948_vm0 = vmmov 0   ;;  %v1804_v1 = vld [vmem:[#allocation5] sm:$0xff]   ;;  %v1805_v2 = vld [vmem:[#allocation5 + $0x8] sm:$0xff]  }
  0x38   :  { %1626 = vmatprep.subr.bf16.mxu0 %v1947_v0  ;;  %1630 = vmatprep.mubr.msk.bf16.mxu0 %vm1948_vm0, %v1947_v0  ;;  %v55_v3 = vld [vmem:[#allocation2] sm:$0xff]  ;;  %vm78_vm1 = vcmask 261120   ;;  %v1806_v5 = vld [vmem:[#allocation5 + $0x10] sm:$0xff]   ;;  %v1808_v7 = vld [vmem:[#allocation5 + $0x20] sm:$0xff]   ;;  %s1949_s2 = smov [#allocation8]  }
  0x39   :  { %1634 = vmatprep.subr.bf16.mxu1 %v1947_v0  ;;  %1638 = vmatprep.mubr.msk.bf16.mxu1 %vm1948_vm0, %v1947_v0  ;;  %v56_v4 = vpack.c.bf16 %v55_v3, %v55_v3  ;;  %v1807_v6 = vld [vmem:[#allocation5 + $0x18] sm:$0xff]   ;;  %v1479_v8 = vld [vmem:[#allocation7] ss:$0 sm:$0xff]  ;;  %v1809_v16 = vld [vmem:[#allocation5 + $0x28] sm:$0xff]   ;;  %s1466_s23 = sshll.u32 %s1949_s2, 4  ;;  %s1467_s23 = int_to_ptr.vmem [resolvable:$true] %s1466_s23 }
  0x3a   :  { %1627 = vmatpush3.bf16.msra.mxu0 %v1804_v1  ;;  %1635 = vmatpush3.bf16.msra.mxu1 %v1806_v5  ;;  %v1810_v17 = vld [vmem:[#allocation5 + $0x30] sm:$0xff]   ;;  %v1811_v26 = vld [vmem:[#allocation5 + $0x38] sm:$0xff]   ;;  %v1812_v27 = vld [vmem:[#allocation5 + $0x40] sm:$0xff]   ;;  %s1912_s24 = scalar_lea.vmem %s1467_s23, 384  ;;  %p1917_p11 = scmp.lt.s32.totalorder %s1467_s23, %s1467_s23 }
  0x3b   :  { %1628 = vmatprep.subr.bf16.mxu0 %v1947_v0  ;;  %1636 = vmatprep.subr.bf16.mxu1 %v1947_v0  ;;  %v1483_v18 = vld [vmem:[#allocation7 + $0x1] ss:$0 sm:$0xff]  ;;  %v1487_v28 = vld [vmem:[#allocation7 + $0x2] ss:$0 sm:$0xff]  ;;  %v1813_v36 = vld [vmem:[#allocation5 + $0x48] sm:$0xff]   ;;  %p1913_p10 = scmp.ne.s32.totalorder %s1467_s23, %s1912_s24  ;;  %p1918_p12 = scmp.lt.s32.totalorder %s1912_s24, %s1912_s24 }
  0x3c   :  { %v1814_v37 = vld [vmem:[#allocation5 + $0x50] sm:$0xff]   ;;  %v1815_v46 = vld [vmem:[#allocation5 + $0x58] sm:$0xff]   ;;  %v1816_v47 = vld [vmem:[#allocation5 + $0x60] sm:$0xff]  }
  0x3d   :  { %v1491_v38 = vld [vmem:[#allocation7 + $0x3] ss:$0 sm:$0xff]  ;;  %v1495_v48 = vld [vmem:[#allocation7 + $0x4] ss:$0 sm:$0xff]  ;;  %v1817_v56 = vld [vmem:[#allocation5 + $0x68] sm:$0xff]   ;;  %p1919_p13 = por %p1918_p12, %p1917_p11 }
  0x3e   :  { %1629 = vmatpush3.bf16.msra.mxu0 %v1805_v2  ;;  %1637 = vmatpush3.bf16.msra.mxu1 %v1807_v6  ;;  %v1818_v57 = vld [vmem:[#allocation5 + $0x70] sm:$0xff]   ;;  %v1819_v3 = vld [vmem:[#allocation5 + $0x78] sm:$0xff]  }
  0x3f   :  { %1642 = vmatprep.subr.bf16.mxu0 %v1947_v0  ;;  %1650 = vmatprep.subr.bf16.mxu1 %v1947_v0  ;;  %v1499_v58 = vld [vmem:[#allocation7 + $0x5] ss:$0 sm:$0xff]  ;;  %v1503_v5 = vld [vmem:[#allocation7 + $0x6] ss:$0 sm:$0xff]  ;;  %p1920_p0 = pnand %p1919_p13, %p1913_p10 }
  0x41   :  { %1631 = vmatmul.mubr.msk.bf16.vlgmr.msra.gmra.mrb[0].mxu0 %vm78_vm1, %v56_v4  ;;  %v1820_v4 = vld [vmem:[#allocation5 + $0x80] sm:$0xff]  }
  0x42   :  { %1646 = vmatprep.mubr.msk.bf16.mxu0 %vm1948_vm0, %v1947_v0  ;;  %1643 = vmatpush3.bf16.msra.mxu0 %v1808_v7 }
  0x43   :  { %1644 = vmatprep.subr.bf16.mxu0 %v1947_v0 }
  0x46   :  { %1645 = vmatpush3.bf16.msra.mxu0 %v1809_v16 }
  0x47   :  { %1658 = vmatprep.subr.bf16.mxu0 %v1947_v0 }
 0x114   :  { %v116_v9 = vpop.f32.mrb[0].mxu0 }
 0x115   :  { %v117_v10 = vadd.f32 %v1479_v8, %v116_v9  ;;  %v1632_v11 = vpop.f32.mrb[1].mxu0 }
 0x116   :  { %v119_v12 = vpop.f32.mrb[2].mxu0 }
 0x117   :  { %v122_v13 = vmax.f32 %v117_v10, 0.0  ;;  %v1633_v14 = vpop.f32.mrb[3].mxu0 }
 0x118   :  { %v1822_v14 = vld [vmem:[#allocation5 + $0x90] sm:$0xff]  }
 0x119   :  { %v123_v15 = vpack.c.bf16 %v122_v13, %v122_v13  ;;  %v1821_v13 = vld [vmem:[#allocation5 + $0x88] sm:$0xff]  }
 0x11b   :  { %1639 = vmatmul.mubr.msk.bf16.vlgmr.msra.gmra.mrb[0].mxu1 %vm78_vm1, %v123_v15  ;;  %v1507_v15 = vld [vmem:[#allocation7 + $0x7] ss:$0 sm:$0xff] }
 0x11c   :  { %1654 = vmatprep.mubr.msk.bf16.mxu1 %vm1948_vm0, %v1947_v0  ;;  %1651 = vmatpush3.bf16.msra.mxu1 %v1810_v17 }
 0x11d   :  { %1652 = vmatprep.subr.bf16.mxu1 %v1947_v0 }
 0x120   :  { %1653 = vmatpush3.bf16.msra.mxu1 %v1811_v26 }
 0x121   :  { %1666 = vmatprep.subr.bf16.mxu1 %v1947_v0 }
 0x1ee   :  { %v183_v19 = vpop.f32.mrb[0].mxu1 }
 0x1ef   :  { %v184_v20 = vadd.f32 %v1483_v18, %v183_v19  ;;  %v1640_v21 = vpop.f32.mrb[1].mxu1 }
 0x1f0   :  { %v186_v22 = vpop.f32.mrb[2].mxu1 }
 0x1f1   :  { %v189_v23 = vmax.f32 %v184_v20, 0.0  ;;  %v1641_v24 = vpop.f32.mrb[3].mxu1 }
 0x1f2   :  { %v1825_v24 = vld [vmem:[#allocation5 + $0xa0] sm:$0xff]  }
 0x1f3   :  { %v190_v25 = vpack.c.bf16 %v189_v23, %v189_v23  ;;  %v1823_v23 = vld [vmem:[#allocation5 + $0x98] sm:$0xff]  }
 0x1f5   :  { %1647 = vmatmul.mubr.msk.bf16.vlgmr.msra.gmra.mrb[4].mxu0 %vm78_vm1, %v190_v25  ;;  %v1511_v25 = vld [vmem:[#allocation7 + $0x8] ss:$0 sm:$0xff] }
 0x1f6   :  { %1662 = vmatprep.mubr.msk.bf16.mxu0 %vm1948_vm0, %v1947_v0  ;;  %1659 = vmatpush3.bf16.msra.mxu0 %v1812_v27 }
 0x1f7   :  { %1660 = vmatprep.subr.bf16.mxu0 %v1947_v0 }
 0x1fa   :  { %1661 = vmatpush3.bf16.msra.mxu0 %v1813_v36  ;;  %v1515_v36 = vld [vmem:[#allocation7 + $0x9] ss:$0 sm:$0xff] }
 0x1fb   :  { %1674 = vmatprep.subr.bf16.mxu0 %v1947_v0 }
 0x2c8   :  { %v250_v29 = vpop.f32.mrb[4].mxu0 }
 0x2c9   :  { %v251_v30 = vadd.f32 %v1487_v28, %v250_v29  ;;  %v1648_v31 = vpop.f32.mrb[5].mxu0 }
 0x2ca   :  { %v253_v32 = vpop.f32.mrb[6].mxu0 }
 0x2cb   :  { %v256_v33 = vmax.f32 %v251_v30, 0.0  ;;  %v1649_v34 = vpop.f32.mrb[7].mxu0  ;;  %v1824_v32 = vld [vmem:[#allocation5 + $0xb0] sm:$0xff]  }
 0x2cc   :  { %v1826_v34 = vld [vmem:[#allocation5 + $0xb8] sm:$0xff]  }
 0x2cd   :  { %v257_v35 = vpack.c.bf16 %v256_v33, %v256_v33 }
 0x2cf   :  { %1655 = vmatmul.mubr.msk.bf16.vlgmr.msra.gmra.mrb[4].mxu1 %vm78_vm1, %v257_v35  ;;  %v1827_v35 = vld [vmem:[#allocation5 + $0xa8] sm:$0xff]  }
 0x2d0   :  { %1670 = vmatprep.mubr.msk.bf16.mxu1 %vm1948_vm0, %v1947_v0  ;;  %1667 = vmatpush3.bf16.msra.mxu1 %v1814_v37 }
 0x2d1   :  { %1668 = vmatprep.subr.bf16.mxu1 %v1947_v0 }
 0x2d4   :  { %1669 = vmatpush3.bf16.msra.mxu1 %v1815_v46  ;;  %v1519_v46 = vld [vmem:[#allocation7 + $0xa] ss:$0 sm:$0xff] }
 0x2d5   :  { %1682 = vmatprep.subr.bf16.mxu1 %v1947_v0 }
 0x3a2   :  { %v317_v39 = vpop.f32.mrb[4].mxu1 }
 0x3a3   :  { %v318_v40 = vadd.f32 %v1491_v38, %v317_v39  ;;  %v1656_v41 = vpop.f32.mrb[5].mxu1 }
 0x3a4   :  { %v320_v42 = vpop.f32.mrb[6].mxu1  ;;  %v1828_v41 = vld [vmem:[#allocation5 + $0xc0] sm:$0xff]  }
 0x3a5   :  { %v323_v43 = vmax.f32 %v318_v40, 0.0  ;;  %v1657_v44 = vpop.f32.mrb[7].mxu1 }
 0x3a6   :  { %v1829_v44 = vld [vmem:[#allocation5 + $0xc8] sm:$0xff]  }
 0x3a7   :  { %v324_v45 = vpack.c.bf16 %v323_v43, %v323_v43 }
 0x3a9   :  { %1663 = vmatmul.mubr.msk.bf16.vlgmr.msra.gmra.mrb[8].mxu0 %vm78_vm1, %v324_v45  ;;  %v1830_v45 = vld [vmem:[#allocation5 + $0xd0] sm:$0xff]  }
 0x3aa   :  { %1678 = vmatprep.mubr.msk.bf16.mxu0 %vm1948_vm0, %v1947_v0  ;;  %1675 = vmatpush3.bf16.msra.mxu0 %v1816_v47  ;;  %v1523_v47 = vld [vmem:[#allocation7 + $0xb] ss:$0 sm:$0xff] }
 0x3ab   :  { %1676 = vmatprep.subr.bf16.mxu0 %v1947_v0 }
 0x3ae   :  { %1677 = vmatpush3.bf16.msra.mxu0 %v1817_v56 }
 0x3af   :  { %1690 = vmatprep.subr.bf16.mxu0 %v1947_v0 }
 0x47c   :  { %v384_v49 = vpop.f32.mrb[8].mxu0 }
 0x47d   :  { %v385_v50 = vadd.f32 %v1495_v48, %v384_v49  ;;  %v1664_v51 = vpop.f32.mrb[9].mxu0 }
 0x47e   :  { %v387_v52 = vpop.f32.mrb[10].mxu0 }
 0x47f   :  { %v390_v53 = vmax.f32 %v385_v50, 0.0  ;;  %v1665_v54 = vpop.f32.mrb[11].mxu0 }
 0x481   :  { %v391_v55 = vpack.c.bf16 %v390_v53, %v390_v53 }
 0x483   :  { %1671 = vmatmul.mubr.msk.bf16.vlgmr.msra.gmra.mrb[8].mxu1 %vm78_vm1, %v391_v55 }
 0x484   :  { %1686 = vmatprep.mubr.msk.bf16.mxu1 %vm1948_vm0, %v1947_v0  ;;  %1683 = vmatpush3.bf16.msra.mxu1 %v1818_v57 }
 0x485   :  { %1684 = vmatprep.subr.bf16.mxu1 %v1947_v0 }
 0x488   :  { %1685 = vmatpush3.bf16.msra.mxu1 %v1819_v3 }
 0x489   :  { %1698 = vmatprep.subr.bf16.mxu1 %v1947_v0 }
 0x556   :  { %v451_v59 = vpop.f32.mrb[8].mxu1 }
 0x557   :  { %v452_v60 = vadd.f32 %v1499_v58, %v451_v59  ;;  %v1672_v61 = vpop.f32.mrb[9].mxu1 }
 0x558   :  { %v454_v62 = vpop.f32.mrb[10].mxu1  ;;  %v1832_v61 = vld [vmem:[#allocation5 + $0xe0] sm:$0xff]  }
 0x559   :  { %v457_v63 = vmax.f32 %v452_v60, 0.0  ;;  %v1673_v1 = vpop.f32.mrb[11].mxu1  ;;  %v1831_v60 = vld [vmem:[#allocation5 + $0xd8] sm:$0xff]  }
 0x55a   :  { %v1527_v62 = vld [vmem:[#allocation7 + $0xc] ss:$0 sm:$0xff] }
 0x55b   :  { %v458_v2 = vpack.c.bf16 %v457_v63, %v457_v63 }
 0x55d   :  { %1679 = vmatmul.mubr.msk.bf16.vlgmr.msra.gmra.mrb[12].mxu0 %vm78_vm1, %v458_v2 }
 0x55e   :  { %1694 = vmatprep.mubr.msk.bf16.mxu0 %vm1948_vm0, %v1947_v0  ;;  %1691 = vmatpush3.bf16.msra.mxu0 %v1820_v4 }
 0x55f   :  { %1692 = vmatprep.subr.bf16.mxu0 %v1947_v0 }
 0x562   :  { %1693 = vmatpush3.bf16.msra.mxu0 %v1821_v13 }
 0x563   :  { %1706 = vmatprep.subr.bf16.mxu0 %v1947_v0 }
 0x630   :  { %v518_v6 = vpop.f32.mrb[12].mxu0 }
 0x631   :  { %v519_v7 = vadd.f32 %v1503_v5, %v518_v6  ;;  %v1680_v8 = vpop.f32.mrb[13].mxu0 }
 0x632   :  { %v521_v9 = vpop.f32.mrb[14].mxu0  ;;  %v1834_v8 = vld [vmem:[#allocation5 + $0xf0] sm:$0xff]  }
 0x633   :  { %v524_v10 = vmax.f32 %v519_v7, 0.0  ;;  %v1681_v11 = vpop.f32.mrb[15].mxu0  ;;  %v1833_v7 = vld [vmem:[#allocation5 + $0xe8] sm:$0xff]   ;;  %v1531_v9 = vld [vmem:[#allocation7 + $0xd] ss:$0 sm:$0xff] }
 0x635   :  { %v525_v12 = vpack.c.bf16 %v524_v10, %v524_v10 }
 0x637   :  { %1687 = vmatmul.mubr.msk.bf16.vlgmr.msra.gmra.mrb[12].mxu1 %vm78_vm1, %v525_v12 }
 0x638   :  { %1702 = vmatprep.mubr.msk.bf16.mxu1 %vm1948_vm0, %v1947_v0  ;;  %1699 = vmatpush3.bf16.msra.mxu1 %v1822_v14 }
 0x639   :  { %1700 = vmatprep.subr.bf16.mxu1 %v1947_v0 }
 0x63c   :  { %1701 = vmatpush3.bf16.msra.mxu1 %v1823_v23 }
 0x63d   :  { %1714 = vmatprep.subr.bf16.mxu1 %v1947_v0 }
 0x70a   :  { %v585_v16 = vpop.f32.mrb[12].mxu1 }
 0x70b   :  { %v586_v17 = vadd.f32 %v1507_v15, %v585_v16  ;;  %v1688_v18 = vpop.f32.mrb[13].mxu1 }
 0x70c   :  { %v588_v19 = vpop.f32.mrb[14].mxu1  ;;  %v1836_v18 = vld [vmem:[#allocation5 + $0x100] sm:$0xff]  }
 0x70d   :  { %v591_v20 = vmax.f32 %v586_v17, 0.0  ;;  %v1689_v21 = vpop.f32.mrb[15].mxu1  ;;  %v1835_v17 = vld [vmem:[#allocation5 + $0xf8] sm:$0xff]  }
 0x70e   :  { %v1535_v19 = vld [vmem:[#allocation7 + $0xe] ss:$0 sm:$0xff] }
 0x70f   :  { %v592_v22 = vpack.c.bf16 %v591_v20, %v591_v20 }
 0x711   :  { %1695 = vmatmul.mubr.msk.bf16.vlgmr.msra.gmra.mrb[16].mxu0 %vm78_vm1, %v592_v22 }
 0x712   :  { %1710 = vmatprep.mubr.msk.bf16.mxu0 %vm1948_vm0, %v1947_v0  ;;  %1707 = vmatpush3.bf16.msra.mxu0 %v1825_v24 }
 0x713   :  { %1708 = vmatprep.subr.bf16.mxu0 %v1947_v0 }
 0x716   :  { %1709 = vmatpush3.bf16.msra.mxu0 %v1827_v35 }
 0x717   :  { %1722 = vmatprep.subr.bf16.mxu0 %v1947_v0 }
 0x7e4   :  { %v652_v26 = vpop.f32.mrb[16].mxu0 }
 0x7e5   :  { %v653_v27 = vadd.f32 %v1511_v25, %v652_v26  ;;  %v1696_v28 = vpop.f32.mrb[17].mxu0 }
 0x7e6   :  { %v655_v29 = vpop.f32.mrb[18].mxu0  ;;  %v1838_v28 = vld [vmem:[#allocation5 + $0x110] sm:$0xff]  }
 0x7e7   :  { %v658_v30 = vmax.f32 %v653_v27, 0.0  ;;  %v1697_v31 = vpop.f32.mrb[19].mxu0  ;;  %v1837_v27 = vld [vmem:[#allocation5 + $0x108] sm:$0xff]   ;;  %v1539_v29 = vld [vmem:[#allocation7 + $0xf] ss:$0 sm:$0xff] }
 0x7e9   :  { %v659_v33 = vpack.c.bf16 %v658_v30, %v658_v30 }
 0x7eb   :  { %1703 = vmatmul.mubr.msk.bf16.vlgmr.msra.gmra.mrb[16].mxu1 %vm78_vm1, %v659_v33 }
 0x7ec   :  { %1715 = vmatpush3.bf16.msra.mxu1 %v1824_v32  ;;  %1718 = vmatprep.mubr.msk.bf16.mxu1 %vm1948_vm0, %v1947_v0 }
 0x7ed   :  { %1716 = vmatprep.subr.bf16.mxu1 %v1947_v0 }
 0x7f0   :  { %1717 = vmatpush3.bf16.msra.mxu1 %v1826_v34 }
 0x7f1   :  { %1730 = vmatprep.subr.bf16.mxu1 %v1947_v0 }
 0x8be   :  { %v719_v37 = vpop.f32.mrb[16].mxu1 }
 0x8bf   :  { %v720_v38 = vadd.f32 %v1515_v36, %v719_v37  ;;  %v1704_v39 = vpop.f32.mrb[17].mxu1  ;;  %v1839_v37 = vld [vmem:[#allocation5 + $0x118] sm:$0xff]  }
 0x8c0   :  { %v722_v40 = vpop.f32.mrb[18].mxu1  ;;  %v1543_v39 = vld [vmem:[#allocation7 + $0x10] ss:$0 sm:$0xff] }
 0x8c1   :  { %725 = vst [vmem:[#allocation8] sm:$0xff] %v720_v38  ;;  %v726_v42 = vpack.c.bf16 %v720_v38, %v720_v38  ;;  %v1705_v43 = vpop.f32.mrb[19].mxu1  ;;  %v1840_v38 = vld [vmem:[#allocation5 + $0x120] sm:$0xff]  }
 0x8c3   :  { %1711 = vmatmul.mubr.msk.bf16.vlgmr.msra.gmra.mrb[20].mxu0 %vm78_vm1, %v726_v42  ;;  %1719 = vmatmul.mubr.msk.bf16.vlgmr.msra.gmra.mrb[20].mxu1 %vm78_vm1, %v726_v42 }
 0x8c4   :  { %1723 = vmatpush3.bf16.msra.mxu0 %v1828_v41  ;;  %1726 = vmatprep.mubr.msk.bf16.mxu0 %vm1948_vm0, %v1947_v0 }
 0x8c5   :  { %1724 = vmatprep.subr.bf16.mxu0 %v1947_v0  ;;  %1734 = vmatprep.mubr.msk.bf16.mxu1 %vm1948_vm0, %v1947_v0 }
 0x8c6   :  { %1731 = vmatpush3.bf16.msra.mxu1 %v1830_v45 }
 0x8c7   :  { %1732 = vmatprep.subr.bf16.mxu1 %v1947_v0 }
 0x8c8   :  { %1725 = vmatpush3.bf16.msra.mxu0 %v1829_v44 }
 0x8c9   :  { %1738 = vmatprep.subr.bf16.mxu0 %v1947_v0 }
 0x8ca   :  { %1733 = vmatpush3.bf16.msra.mxu1 %v1831_v60 }
 0x8cb   :  { %1746 = vmatprep.subr.bf16.mxu1 %v1947_v0 }
 0x996   :  { %v786_v48 = vpop.f32.mrb[20].mxu0  ;;  %v850_v49 = vpop.f32.mrb[20].mxu1 }
 0x997   :  { %v787_v50 = vadd.f32 %v1519_v46, %v786_v48  ;;  %v851_v51 = vadd.f32 %v1523_v47, %v850_v49  ;;  %v1712_v52 = vpop.f32.mrb[21].mxu0  ;;  %v1720_v53 = vpop.f32.mrb[21].mxu1  ;;  %v1841_v47 = vld [vmem:[#allocation5 + $0x128] sm:$0xff]   ;;  %v1842_v48 = vld [vmem:[#allocation5 + $0x130] sm:$0xff]   ;;  %v1547_v49 = vld [vmem:[#allocation7 + $0x11] ss:$0 sm:$0xff] }
 0x998   :  { %v789_v54 = vpop.f32.mrb[22].mxu0  ;;  %v853_v55 = vpop.f32.mrb[22].mxu1 }
 0x999   :  { %793 = vst [vmem:[#allocation8 + $0x8] sm:$0xff] %v787_v50  ;;  %v856_v56 = vmax.f32 %v851_v51, 0.0  ;;  %v1713_v57 = vpop.f32.mrb[23].mxu0  ;;  %v1721_v58 = vpop.f32.mrb[23].mxu1 }
 0x99a   :  { %v1843_v57 = vld [vmem:[#allocation5 + $0x138] sm:$0xff]   ;;  %v1844_v58 = vld [vmem:[#allocation5 + $0x140] sm:$0xff]  }
 0x99b   :  { %v857_v59 = vpack.c.bf16 %v856_v56, %v856_v56 }
 0x99d   :  { %1727 = vmatmul.mubr.msk.bf16.vlgmr.msra.gmra.mrb[24].mxu0 %vm78_vm1, %v857_v59  ;;  %v1551_v59 = vld [vmem:[#allocation7 + $0x12] ss:$0 sm:$0xff] }
 0x99e   :  { %1742 = vmatprep.mubr.msk.bf16.mxu0 %vm1948_vm0, %v1947_v0  ;;  %1739 = vmatpush3.bf16.msra.mxu0 %v1832_v61 }
 0x99f   :  { %1740 = vmatprep.subr.bf16.mxu0 %v1947_v0 }
 0x9a2   :  { %1741 = vmatpush3.bf16.msra.mxu0 %v1833_v7 }
 0x9a3   :  { %1754 = vmatprep.subr.bf16.mxu0 %v1947_v0 }
 0xa70   :  { %v917_v63 = vpop.f32.mrb[24].mxu0 }
 0xa71   :  { %v918_v1 = vadd.f32 %v1527_v62, %v917_v63  ;;  %v1728_v2 = vpop.f32.mrb[25].mxu0 }
 0xa72   :  { %v920_v3 = vpop.f32.mrb[26].mxu0 }
 0xa73   :  { %v923_v4 = vmax.f32 %v918_v1, 0.0  ;;  %v1729_v5 = vpop.f32.mrb[27].mxu0 }
 0xa74   :  { %v1555_v5 = vld [vmem:[#allocation7 + $0x13] ss:$0 sm:$0xff] }
 0xa75   :  { %v924_v6 = vpack.c.bf16 %v923_v4, %v923_v4  ;;  %v1845_v4 = vld [vmem:[#allocation5 + $0x148] sm:$0xff]  }
 0xa77   :  { %1735 = vmatmul.mubr.msk.bf16.vlgmr.msra.gmra.mrb[24].mxu1 %vm78_vm1, %v924_v6 }
 0xa78   :  { %1750 = vmatprep.mubr.msk.bf16.mxu1 %vm1948_vm0, %v1947_v0  ;;  %1747 = vmatpush3.bf16.msra.mxu1 %v1834_v8 }
 0xa79   :  { %1748 = vmatprep.subr.bf16.mxu1 %v1947_v0 }
 0xa7c   :  { %1749 = vmatpush3.bf16.msra.mxu1 %v1835_v17 }
 0xa7d   :  { %1762 = vmatprep.subr.bf16.mxu1 %v1947_v0 }
 0xb4a   :  { %v984_v10 = vpop.f32.mrb[24].mxu1 }
 0xb4b   :  { %v985_v11 = vadd.f32 %v1531_v9, %v984_v10  ;;  %v1736_v12 = vpop.f32.mrb[25].mxu1 }
 0xb4c   :  { %v987_v13 = vpop.f32.mrb[26].mxu1  ;;  %v1559_v12 = vld [vmem:[#allocation7 + $0x14] ss:$0 sm:$0xff] }
 0xb4d   :  { %v990_v14 = vmax.f32 %v985_v11, 0.0  ;;  %v1737_v15 = vpop.f32.mrb[27].mxu1 }
 0xb4f   :  { %v991_v16 = vpack.c.bf16 %v990_v14, %v990_v14 }
 0xb51   :  { %1743 = vmatmul.mubr.msk.bf16.vlgmr.msra.gmra.mrb[28].mxu0 %vm78_vm1, %v991_v16 }
 0xb52   :  { %1758 = vmatprep.mubr.msk.bf16.mxu0 %vm1948_vm0, %v1947_v0  ;;  %1755 = vmatpush3.bf16.msra.mxu0 %v1836_v18 }
 0xb53   :  { %1756 = vmatprep.subr.bf16.mxu0 %v1947_v0 }
 0xb56   :  { %1757 = vmatpush3.bf16.msra.mxu0 %v1837_v27 }
 0xb57   :  { %1770 = vmatprep.subr.bf16.mxu0 %v1947_v0 }
 0xc24   :  { %v1051_v20 = vpop.f32.mrb[28].mxu0 }
 0xc25   :  { %v1052_v21 = vadd.f32 %v1535_v19, %v1051_v20  ;;  %v1744_v22 = vpop.f32.mrb[29].mxu0 }
 0xc26   :  { %v1054_v23 = vpop.f32.mrb[30].mxu0 }
 0xc27   :  { %v1057_v24 = vmax.f32 %v1052_v21, 0.0  ;;  %v1745_v25 = vpop.f32.mrb[31].mxu0 }
 0xc29   :  { %v1058_v26 = vpack.c.bf16 %v1057_v24, %v1057_v24 }
 0xc2b   :  { %1751 = vmatmul.mubr.msk.bf16.vlgmr.msra.gmra.mrb[28].mxu1 %vm78_vm1, %v1058_v26 }
 0xc2c   :  { %1766 = vmatprep.mubr.msk.bf16.mxu1 %vm1948_vm0, %v1947_v0  ;;  %1763 = vmatpush3.bf16.msra.mxu1 %v1838_v28 }
 0xc2d   :  { %1764 = vmatprep.subr.bf16.mxu1 %v1947_v0 }
 0xc30   :  { %1765 = vmatpush3.bf16.msra.mxu1 %v1839_v37 }
 0xc31   :  { %1778 = vmatprep.subr.bf16.mxu1 %v1947_v0 }
 0xcfe   :  { %v1118_v30 = vpop.f32.mrb[28].mxu1 }
 0xcff   :  { %v1119_v31 = vadd.f32 %v1539_v29, %v1118_v30  ;;  %v1752_v32 = vpop.f32.mrb[29].mxu1 }
 0xd00   :  { %v1121_v33 = vpop.f32.mrb[30].mxu1 }
 0xd01   :  { %v1124_v34 = vmax.f32 %v1119_v31, 0.0  ;;  %v1753_v35 = vpop.f32.mrb[31].mxu1 }
 0xd03   :  { %v1125_v36 = vpack.c.bf16 %v1124_v34, %v1124_v34 }
 0xd05   :  { %1759 = vmatmul.mubr.msk.bf16.vlgmr.msra.gmra.mrb[32].mxu0 %vm78_vm1, %v1125_v36 }
 0xd06   :  { %1774 = vmatprep.mubr.msk.bf16.mxu0 %vm1948_vm0, %v1947_v0  ;;  %1771 = vmatpush3.bf16.msra.mxu0 %v1840_v38 }
 0xd07   :  { %1772 = vmatprep.subr.bf16.mxu0 %v1947_v0 }
 0xd0a   :  { %1773 = vmatpush3.bf16.msra.mxu0 %v1841_v47 }
 0xd0b   :  { %1786 = vmatprep.subr.bf16.mxu0 %v1947_v0 }
 0xdd8   :  { %v1185_v40 = vpop.f32.mrb[32].mxu0 }
 0xdd9   :  { %v1186_v41 = vadd.f32 %v1543_v39, %v1185_v40  ;;  %v1760_v42 = vpop.f32.mrb[33].mxu0 }
 0xdda   :  { %v1188_v43 = vpop.f32.mrb[34].mxu0 }
 0xddb   :  { %v1191_v44 = vmax.f32 %v1186_v41, 0.0  ;;  %v1761_v45 = vpop.f32.mrb[35].mxu0 }
 0xddd   :  { %v1192_v46 = vpack.c.bf16 %v1191_v44, %v1191_v44 }
 0xddf   :  { %1767 = vmatmul.mubr.msk.bf16.vlgmr.msra.gmra.mrb[32].mxu1 %vm78_vm1, %v1192_v46 }
 0xde0   :  { %1782 = vmatprep.mubr.msk.bf16.mxu1 %vm1948_vm0, %v1947_v0  ;;  %1779 = vmatpush3.bf16.msra.mxu1 %v1842_v48 }
 0xde1   :  { %1780 = vmatprep.subr.bf16.mxu1 %v1947_v0 }
 0xde4   :  { %1781 = vmatpush3.bf16.msra.mxu1 %v1843_v57 }
 0xeb2   :  { %v1252_v50 = vpop.f32.mrb[32].mxu1 }
 0xeb3   :  { %v1253_v51 = vadd.f32 %v1547_v49, %v1252_v50  ;;  %v1768_v52 = vpop.f32.mrb[33].mxu1 }
 0xeb4   :  { %v1255_v53 = vpop.f32.mrb[34].mxu1 }
 0xeb5   :  { %v1258_v54 = vmax.f32 %v1253_v51, 0.0  ;;  %v1769_v55 = vpop.f32.mrb[35].mxu1 }
 0xeb7   :  { %v1259_v56 = vpack.c.bf16 %v1258_v54, %v1258_v54 }
 0xeb9   :  { %1775 = vmatmul.mubr.msk.bf16.vlgmr.msra.gmra.mrb[36].mxu0 %vm78_vm1, %v1259_v56 }
 0xeba   :  { %1790 = vmatprep.mubr.msk.bf16.mxu0 %vm1948_vm0, %v1947_v0  ;;  %1787 = vmatpush3.bf16.msra.mxu0 %v1844_v58 }
 0xebb   :  { %1788 = vmatprep.subr.bf16.mxu0 %v1947_v0 }
 0xebe   :  { %1789 = vmatpush3.bf16.msra.mxu0 %v1845_v4 }
 0xf8c   :  { %v1319_v60 = vpop.f32.mrb[36].mxu0 }
 0xf8d   :  { %v1320_v61 = vadd.f32 %v1551_v59, %v1319_v60  ;;  %v1776_v62 = vpop.f32.mrb[37].mxu0 }
 0xf8e   :  { %v1322_v63 = vpop.f32.mrb[38].mxu0 }
 0xf8f   :  { %v1325_v1 = vmax.f32 %v1320_v61, 0.0  ;;  %v1777_v2 = vpop.f32.mrb[39].mxu0 }
 0xf91   :  { %v1326_v3 = vpack.c.bf16 %v1325_v1, %v1325_v1 }
 0xf93   :  { %1783 = vmatmul.mubr.msk.bf16.vlgmr.msra.gmra.mrb[36].mxu1 %vm78_vm1, %v1326_v3 }
0x1066   :  { %v1386_v6 = vpop.f32.mrb[36].mxu1 }
0x1067   :  { %v1387_v7 = vadd.f32 %v1555_v5, %v1386_v6  ;;  %v1784_v8 = vpop.f32.mrb[37].mxu1 }
0x1068   :  { %v1389_v9 = vpop.f32.mrb[38].mxu1 }
0x1069   :  { %v1392_v10 = vmax.f32 %v1387_v7, 0.0  ;;  %v1785_v11 = vpop.f32.mrb[39].mxu1 }
0x106b   :  { %v1393_v0 = vpack.c.bf16 %v1392_v10, %v1392_v10 }
0x106d   :  { %1791 = vmatmul.mubr.msk.bf16.vlgmr.msra.gmra.mrb[40].mxu0 %vm78_vm1, %v1393_v0 }
0x1140   :  { %v1453_v13 = vpop.f32.mrb[40].mxu0 }
0x1141   :  { %v1454_v14 = vadd.f32 %v1559_v12, %v1453_v13  ;;  %v1792_v15 = vpop.f32.mrb[41].mxu0 }
0x1142   :  { %v1456_v16 = vpop.f32.mrb[42].mxu0 }
0x1143   :  { %1460 = vst [vmem:[#allocation8 + $0x10] sm:$0xff] %v1454_v14  ;;  %v1793_v17 = vpop.f32.mrb[43].mxu0 }
0x1144   :  { %1923 = shalt.err (!%p1920_p0)
}
0x1145   :  { %s1924_s27 = scalar_lea.hbm %s2132_s3, 384 }
0x1146   :  { %p1925_p1 = scmp.ne.s32.totalorder %s2132_s3, %s1924_s27  ;;  %p1928_p2 = scmp.lt.u32.totalorder %s1924_s27, %s2132_s3 }
0x1148   :  { %p1930_p3 = pnand %p1928_p2, %p1925_p1 }
0x114a   :  { %1933 = shalt.err (!%p1930_p3)
}
0x114b   :  { %1472 = dma.vmem_to_hbm [thread:$0]  %s1467_s23, 384, %s2132_s3, [#allocation4], %s1945_s0, %s1945_s0, %s1946_s20  }
0x114c   :  { %1938 = dma.done.wait [#allocation4], 384  }
0x114d   :  { %1939 = vsyncadd [#allocation4], 4294966912 }
0x114e   :  { %1476 = vsyncpa [#allocation3], 1 }
0x114f   :  { %1477 = vsyncpa [#allocation6], 1 }
0x1150   :  { %1478 = vsyncpa [#allocation4], 1 }

</bundles_post_ra>
